<compile_context>
chip_gen: v7x
topology: tpu7x:2x2x1
jax: 0.10.0
libtpu: 0.0.40
codegen_flags: <defaults>
</compile_context>

<pallas_src>
import jax
import jax.numpy as jnp
from jax.experimental import pallas as pl
from jax.experimental.pallas import tpu as pltpu


def _make_kernel(tile_b, seq_len, num_feat):
    inv_len = 1.0 / float(seq_len)

    def kernel(deep_ref,   # VMEM  [L, TB]  int32   deep indices (batch on lanes)
               wide_ref,   # VMEM  [F, TB]  f32     wide features (batch on lanes)
               ww_ref,     # VMEM  [F, 1]   f32     wide weight column
               embT_ref,   # VMEM  [E, F]   f32     embedding table, transposed
               w1T_ref,    # VMEM  [H, E]   f32     fc1 weight, transposed
               b1_ref,     # VMEM  [H, 1]   f32     fc1 bias column
               w2_ref,     # VMEM  [H, 1]   f32     fc2 weight column
               bias_ref,   # SMEM  [1, 1]   f32     wide_b + b2 combined
               out_ref):   # VMEM  [1, TB]  f32     lane-dense output row
        # ---- deep branch: one-hot counts (VPU) + mean embedding (MXU) -----
        # countsT[f, b] = #{ l : deep[l, b] == f }  -> (F, TB)
        idx = deep_ref[...]                                          # (L, TB) int32
        iota_f = jax.lax.broadcasted_iota(jnp.int32, (num_feat, tile_b), 0)
        counts = jnp.zeros((num_feat, tile_b), jnp.float32)
        for l in range(seq_len):                                     # tiny static unroll
            counts = counts + (iota_f == idx[l:l + 1, :]).astype(jnp.float32)

        # mean embedding, (E, TB) = (E, F) @ (F, TB) scaled by 1/L
        embed_mean = jnp.dot(embT_ref[...], counts,
                             preferred_element_type=jnp.float32) * inv_len

        # ---- fc1 + ReLU on the MXU, batch stays on lanes -------------------
        h = jnp.dot(w1T_ref[...], embed_mean,
                    preferred_element_type=jnp.float32) + b1_ref[...]  # (H, TB)
        h = jnp.maximum(h, 0.0)

        # ---- fc2 (N=1) and wide linear as sublane reductions ---------------
        deep_out = jnp.sum(h * w2_ref[...], axis=0, keepdims=True)          # (1, TB)
        wide_out = jnp.sum(wide_ref[...] * ww_ref[...], axis=0, keepdims=True)

        out_ref[...] = wide_out + deep_out + bias_ref[0, 0]          # (1, TB)

    return kernel


def wide_and_deep_forward(wide_input, deep_input, params, *, tile_b=256):
    """Pallas-backed forward pass matching the PyTorch WideAndDeep module."""
    B, F = wide_input.shape
    _, L = deep_input.shape
    E = params["emb_table"].shape[1]
    H = params["w1"].shape[1]

    # Pad the batch to a multiple of the tile so every grid step is full.
    nb = pl.cdiv(B, tile_b)
    b_pad = nb * tile_b
    pad = b_pad - B

    # Layout plumbing only: batch on the lane (last) axis everywhere.
    wide_t = jnp.pad(wide_input.astype(jnp.float32).T, ((0, 0), (0, pad)))  # (F, b_pad)
    deep_t = jnp.pad(deep_input.astype(jnp.int32).T, ((0, 0), (0, pad)))    # (L, b_pad)

    emb_t = params["emb_table"].astype(jnp.float32).T                       # (E, F)
    ww_col = params["wide_w"].reshape(F, 1).astype(jnp.float32)
    w1_t = params["w1"].astype(jnp.float32).T                               # (H, E)
    b1_col = params["b1"].reshape(H, 1).astype(jnp.float32)
    w2_col = params["w2"].reshape(H, 1).astype(jnp.float32)
    bias_total = (params["wide_b"] + params["b2"]).reshape(1, 1).astype(jnp.float32)

    kernel = _make_kernel(tile_b, L, F)

    out = pl.pallas_call(
        kernel,
        out_shape=jax.ShapeDtypeStruct((nb, tile_b), jnp.float32),
        grid=(nb,),
        in_specs=[
            pl.BlockSpec((L, tile_b), lambda i: (0, i)),   # deep indices tile
            pl.BlockSpec((F, tile_b), lambda i: (0, i)),   # wide features tile
            pl.BlockSpec((F, 1), lambda i: (0, 0)),        # wide weight column
            pl.BlockSpec((E, F), lambda i: (0, 0)),        # embedding table (E, F)
            pl.BlockSpec((H, E), lambda i: (0, 0)),        # fc1 weight (H, E)
            pl.BlockSpec((H, 1), lambda i: (0, 0)),        # fc1 bias column
            pl.BlockSpec((H, 1), lambda i: (0, 0)),        # fc2 weight column
            pl.BlockSpec(memory_space=pltpu.MemorySpace.SMEM),  # combined scalar bias
        ],
        out_specs=pl.BlockSpec((1, tile_b), lambda i: (i, 0)),
        compiler_params=pltpu.CompilerParams(
            dimension_semantics=("parallel",),             # megacore / v7x 2-TC split
            vmem_limit_bytes=32 * 1024 * 1024,
        ),
    )(deep_t, wide_t, ww_col, emb_t, w1_t, b1_col, w2_col, bias_total)

    # (nb, tile_b) lane-dense slab -> (B, 1); padded rows are garbage and dropped.
    return out.reshape(b_pad)[:B].reshape(B, 1)


def init_params(key, num_wide_features, embedding_dim, hidden_dim):
    ks = jax.random.split(key, 7)
    # Weights stored pre-transposed relative to torch's nn.Linear (out, in).
    return {
        "wide_w": jax.random.normal(ks[0], (num_wide_features, 1), jnp.float32) * 0.1,
        "wide_b": jax.random.normal(ks[1], (1, 1), jnp.float32) * 0.1,
        "emb_table": jax.random.normal(ks[2], (num_wide_features, embedding_dim), jnp.float32),
        "w1": jax.random.normal(ks[3], (embedding_dim, hidden_dim), jnp.float32) * 0.1,
        "b1": jax.random.normal(ks[4], (1, hidden_dim), jnp.float32) * 0.1,
        "w2": jax.random.normal(ks[5], (hidden_dim, 1), jnp.float32) * 0.1,
        "b2": jax.random.normal(ks[6], (1, 1), jnp.float32) * 0.1,
    }


def reference_forward(wide_input, deep_input, params):
    """Pure-JAX f32 reference mirroring the PyTorch semantics exactly."""
    wide_out = wide_input @ params["wide_w"] + params["wide_b"]
    emb = params["emb_table"][deep_input]            # [B, L, E]
    emb_mean = emb.mean(axis=1)                      # [B, E]
    h = jax.nn.relu(emb_mean @ params["w1"] + params["b1"])
    deep_out = h @ params["w2"] + params["b2"]
    return wide_out + deep_out


if __name__ == "__main__":
    key = jax.random.PRNGKey(0)
    k_in, k_idx, k_par = jax.random.split(key, 3)

    B = 10                    # batch (padded to one 256-wide lane tile)
    num_wide_features = 8     # wide feature count == embedding vocab size
    embedding_dim = 16
    hidden_dim = 32
    L = 4                     # deep input sequence length

    wide_input = jax.random.normal(k_in, (B, num_wide_features), jnp.float32)
    deep_input = jax.random.randint(k_idx, (B, L), 0, num_wide_features, jnp.int32)
    params = init_params(k_par, num_wide_features, embedding_dim, hidden_dim)

    out = wide_and_deep_forward(wide_input, deep_input, params)
    out = jax.block_until_ready(out)

    ref = reference_forward(wide_input, deep_input, params)
    assert out.shape == (B, 1)
    assert jnp.allclose(out, ref, atol=1e-2, rtol=1e-2), (
        f"max abs err {jnp.max(jnp.abs(out - ref))}")

    print("KERNEL_OK")
</pallas_src>

<mosaic_0001>
module attributes {stable_mosaic.version = 11 : i64} {
  func.func @kernel(%arg0: i32, %arg1: memref<4x256xi32, #tpu.memory_space<vmem>>, %arg2: memref<8x256xf32, #tpu.memory_space<vmem>>, %arg3: memref<8x1xf32, #tpu.memory_space<vmem>>, %arg4: memref<16x8xf32, #tpu.memory_space<vmem>>, %arg5: memref<32x16xf32, #tpu.memory_space<vmem>>, %arg6: memref<32x1xf32, #tpu.memory_space<vmem>>, %arg7: memref<32x1xf32, #tpu.memory_space<vmem>>, %arg8: memref<1x1xf32, #tpu.memory_space<smem>>, %arg9: memref<1x256xf32, #tpu.memory_space<vmem>>) attributes {dimension_semantics = [#tpu.dimension_semantics<parallel>], iteration_bounds = array<i64: 1>, scalar_prefetch = 0 : i64, scratch_operands = 0 : i64, tpu.core_type = #tpu.core_type<tc>, window_params = [{transform_indices = @transform_0, window_bounds = array<i64: 4, 256>}, {transform_indices = @transform_1, window_bounds = array<i64: 8, 256>}, {pipeline_mode = #tpu.pipeline_mode<synchronous>, transform_indices = @transform_2, window_bounds = array<i64: 8, 1>}, {pipeline_mode = #tpu.pipeline_mode<synchronous>, transform_indices = @transform_3, window_bounds = array<i64: 16, 8>}, {pipeline_mode = #tpu.pipeline_mode<synchronous>, transform_indices = @transform_4, window_bounds = array<i64: 32, 16>}, {pipeline_mode = #tpu.pipeline_mode<synchronous>, transform_indices = @transform_5, window_bounds = array<i64: 32, 1>}, {pipeline_mode = #tpu.pipeline_mode<synchronous>, transform_indices = @transform_6, window_bounds = array<i64: 32, 1>}, {transform_indices = @transform_7, window_bounds = array<i64: 1, 1>}, {transform_indices = @transform_8, window_bounds = array<i64: 1, 256>}]} {
    %c0 = arith.constant 0 : index
    %c0_0 = arith.constant 0 : index
    %0 = vector.load %arg1[%c0, %c0_0] : memref<4x256xi32, #tpu.memory_space<vmem>>, vector<4x256xi32>
    %1 = tpu.iota {dimensions = array<i32: 0>} : vector<8x256xi32>
    %cst = arith.constant 0.000000e+00 : f32
    %2 = vector.broadcast %cst : f32 to vector<8x256xf32>
    %3 = vector.extract_strided_slice %0 {offsets = [0, 0], sizes = [1, 256], strides = [1, 1]} : vector<4x256xi32> to vector<1x256xi32>
    %4 = vector.broadcast %3 : vector<1x256xi32> to vector<8x256xi32>
    %5 = arith.cmpi eq, %1, %4 : vector<8x256xi32>
    %6 = arith.extui %5 : vector<8x256xi1> to vector<8x256xi32>
    %7 = arith.sitofp %6 : vector<8x256xi32> to vector<8x256xf32>
    %8 = arith.addf %2, %7 : vector<8x256xf32>
    %9 = vector.extract_strided_slice %0 {offsets = [1, 0], sizes = [1, 256], strides = [1, 1]} : vector<4x256xi32> to vector<1x256xi32>
    %10 = vector.broadcast %9 : vector<1x256xi32> to vector<8x256xi32>
    %11 = arith.cmpi eq, %1, %10 : vector<8x256xi32>
    %12 = arith.extui %11 : vector<8x256xi1> to vector<8x256xi32>
    %13 = arith.sitofp %12 : vector<8x256xi32> to vector<8x256xf32>
    %14 = arith.addf %8, %13 : vector<8x256xf32>
    %15 = vector.extract_strided_slice %0 {offsets = [2, 0], sizes = [1, 256], strides = [1, 1]} : vector<4x256xi32> to vector<1x256xi32>
    %16 = vector.broadcast %15 : vector<1x256xi32> to vector<8x256xi32>
    %17 = arith.cmpi eq, %1, %16 : vector<8x256xi32>
    %18 = arith.extui %17 : vector<8x256xi1> to vector<8x256xi32>
    %19 = arith.sitofp %18 : vector<8x256xi32> to vector<8x256xf32>
    %20 = arith.addf %14, %19 : vector<8x256xf32>
    %21 = vector.extract_strided_slice %0 {offsets = [3, 0], sizes = [1, 256], strides = [1, 1]} : vector<4x256xi32> to vector<1x256xi32>
    %22 = vector.broadcast %21 : vector<1x256xi32> to vector<8x256xi32>
    %23 = arith.cmpi eq, %1, %22 : vector<8x256xi32>
    %24 = arith.extui %23 : vector<8x256xi1> to vector<8x256xi32>
    %25 = arith.sitofp %24 : vector<8x256xi32> to vector<8x256xf32>
    %26 = arith.addf %20, %25 : vector<8x256xf32>
    %c0_1 = arith.constant 0 : index
    %c0_2 = arith.constant 0 : index
    %27 = vector.load %arg4[%c0_1, %c0_2] : memref<16x8xf32, #tpu.memory_space<vmem>>, vector<16x8xf32>
    %cst_3 = arith.constant dense<0.000000e+00> : vector<16x256xf32>
    %28 = tpu.matmul %27, %26, %cst_3 {dimension_numbers = #tpu.dot_dimension_numbers<[1], [0], [0], [1], [0, 0, 1, 1], [], []>} : vector<16x8xf32>, vector<8x256xf32>, vector<16x256xf32> -> vector<16x256xf32>
    %cst_4 = arith.constant 2.500000e-01 : f32
    %29 = vector.broadcast %cst_4 : f32 to vector<16x256xf32>
    %30 = arith.mulf %28, %29 : vector<16x256xf32>
    %c0_5 = arith.constant 0 : index
    %c0_6 = arith.constant 0 : index
    %31 = vector.load %arg5[%c0_5, %c0_6] : memref<32x16xf32, #tpu.memory_space<vmem>>, vector<32x16xf32>
    %cst_7 = arith.constant dense<0.000000e+00> : vector<32x256xf32>
    %32 = tpu.matmul %31, %30, %cst_7 {dimension_numbers = #tpu.dot_dimension_numbers<[1], [0], [0], [1], [0, 0, 1, 1], [], []>} : vector<32x16xf32>, vector<16x256xf32>, vector<32x256xf32> -> vector<32x256xf32>
    %c0_8 = arith.constant 0 : index
    %c0_9 = arith.constant 0 : index
    %33 = vector.load %arg6[%c0_8, %c0_9] : memref<32x1xf32, #tpu.memory_space<vmem>>, vector<32x1xf32>
    %34 = vector.broadcast %33 : vector<32x1xf32> to vector<32x256xf32>
    %35 = arith.addf %32, %34 : vector<32x256xf32>
    %cst_10 = arith.constant 0.000000e+00 : f32
    %36 = vector.broadcast %cst_10 : f32 to vector<32x256xf32>
    %37 = arith.maximumf %35, %36 : vector<32x256xf32>
    %c0_11 = arith.constant 0 : index
    %c0_12 = arith.constant 0 : index
    %38 = vector.load %arg7[%c0_11, %c0_12] : memref<32x1xf32, #tpu.memory_space<vmem>>, vector<32x1xf32>
    %39 = vector.broadcast %38 : vector<32x1xf32> to vector<32x256xf32>
    %40 = arith.mulf %37, %39 : vector<32x256xf32>
    %cst_13 = arith.constant dense<0.000000e+00> : vector<256xf32>
    %41 = vector.multi_reduction <add>, %40, %cst_13 [0] : vector<32x256xf32> to vector<256xf32>
    %42 = vector.shape_cast %41 : vector<256xf32> to vector<1x256xf32>
    %c0_14 = arith.constant 0 : index
    %c0_15 = arith.constant 0 : index
    %43 = vector.load %arg2[%c0_14, %c0_15] : memref<8x256xf32, #tpu.memory_space<vmem>>, vector<8x256xf32>
    %c0_16 = arith.constant 0 : index
    %c0_17 = arith.constant 0 : index
    %44 = vector.load %arg3[%c0_16, %c0_17] : memref<8x1xf32, #tpu.memory_space<vmem>>, vector<8x1xf32>
    %45 = vector.broadcast %44 : vector<8x1xf32> to vector<8x256xf32>
    %46 = arith.mulf %43, %45 : vector<8x256xf32>
    %cst_18 = arith.constant dense<0.000000e+00> : vector<256xf32>
    %47 = vector.multi_reduction <add>, %46, %cst_18 [0] : vector<8x256xf32> to vector<256xf32>
    %48 = vector.shape_cast %47 : vector<256xf32> to vector<1x256xf32>
    %49 = arith.addf %48, %42 : vector<1x256xf32>
    %c0_19 = arith.constant 0 : index
    %c0_20 = arith.constant 0 : index
    %50 = memref.load %arg8[%c0_19, %c0_20] : memref<1x1xf32, #tpu.memory_space<smem>>
    %51 = vector.broadcast %50 : f32 to vector<1x256xf32>
    %52 = arith.addf %49, %51 : vector<1x256xf32>
    %c0_21 = arith.constant 0 : index
    %c0_22 = arith.constant 0 : index
    %53 = vector.load %arg9[%c0_21, %c0_22] : memref<1x256xf32, #tpu.memory_space<vmem>>, vector<1x256xf32>
    tpu.vector_store %arg9[%c0_21, %c0_22], %52 {strides = array<i32>} : memref<1x256xf32, #tpu.memory_space<vmem>>, vector<1x256xf32>,
    return
  }
  func.func @transform_0(%arg0: i32) -> (i32, i32) {
    %c0_i32 = arith.constant 0 : i32
    %c0_i32_0 = arith.constant 0 : i32
    return %c0_i32, %arg0 : i32, i32
  }
  func.func @transform_1(%arg0: i32) -> (i32, i32) {
    %c0_i32 = arith.constant 0 : i32
    %c0_i32_0 = arith.constant 0 : i32
    return %c0_i32, %arg0 : i32, i32
  }
  func.func @transform_2(%arg0: i32) -> (i32, i32) {
    %c0_i32 = arith.constant 0 : i32
    %c0_i32_0 = arith.constant 0 : i32
    %c0_i32_1 = arith.constant 0 : i32
    return %c0_i32, %c0_i32_0 : i32, i32
  }
  func.func @transform_3(%arg0: i32) -> (i32, i32) {
    %c0_i32 = arith.constant 0 : i32
    %c0_i32_0 = arith.constant 0 : i32
    %c0_i32_1 = arith.constant 0 : i32
    return %c0_i32, %c0_i32_0 : i32, i32
  }
  func.func @transform_4(%arg0: i32) -> (i32, i32) {
    %c0_i32 = arith.constant 0 : i32
    %c0_i32_0 = arith.constant 0 : i32
    %c0_i32_1 = arith.constant 0 : i32
    return %c0_i32, %c0_i32_0 : i32, i32
  }
  func.func @transform_5(%arg0: i32) -> (i32, i32) {
    %c0_i32 = arith.constant 0 : i32
    %c0_i32_0 = arith.constant 0 : i32
    %c0_i32_1 = arith.constant 0 : i32
    return %c0_i32, %c0_i32_0 : i32, i32
  }
  func.func @transform_6(%arg0: i32) -> (i32, i32) {
    %c0_i32 = arith.constant 0 : i32
    %c0_i32_0 = arith.constant 0 : i32
    %c0_i32_1 = arith.constant 0 : i32
    return %c0_i32, %c0_i32_0 : i32, i32
  }
  func.func @transform_7(%arg0: i32) -> (i32, i32) {
    %c0_i32 = arith.constant 0 : i32
    %c0_i32_0 = arith.constant 0 : i32
    %c0_i32_1 = arith.constant 0 : i32
    return %c0_i32, %c0_i32_0 : i32, i32
  }
  func.func @transform_8(%arg0: i32) -> (i32, i32) {
    %c0_i32 = arith.constant 0 : i32
    %c0_i32_0 = arith.constant 0 : i32
    return %arg0, %c0_i32 : i32, i32
  }
}

</mosaic_0001>

<bundles_post_ra>
// kernel: tpu_custom_call.1
= control target key start
LH: loop header
LB: loop body
LE: loop exit
PB: predicated region body
PF: predicated region fallthrough
CT: control target
= control target key end

     0   :  { %v32_v0 = vlaneseq  ;;  %v523_v1 = vmov 0.0   ;;  %s676_s0 = inlined_call_operand.vmem [shape: s32[4,256], index: 0, kind: input, shape index: {}]   ;;  %s677_s1 = inlined_call_operand.vmem [shape: f32[8,256], index: 1, kind: input, shape index: {}]   ;;  %s678_s2 = inlined_call_operand.vmem [shape: f32[8,1], index: 2, kind: input, shape index: {}]   ;;  %s679_s3 = inlined_call_operand.vmem [shape: f32[16,8], index: 3, kind: input, shape index: {}]   ;;  %s680_s4 = inlined_call_operand.vmem [shape: f32[32,16], index: 4, kind: input, shape index: {}]   ;;  %s681_s5 = inlined_call_operand.vmem [shape: f32[32,1], index: 5, kind: input, shape index: {}]   ;;  %s682_s6 = inlined_call_operand.vmem [shape: f32[32,1], index: 6, kind: input, shape index: {}]   ;;  %s683_s7 = inlined_call_operand.<no memory space> [shape: f32[1,1], index: 7, kind: input, shape index: {}]   ;;  %s684_s8 = inlined_call_operand.hbm [shape: f32[1,256], index: 8, kind: output, shape index: {}]  }
   0x1   :  { %203 = vmatprep.mubr.f32.mxu0 %v523_v1  ;;  %331 = vmatprep.mubr.f32.mxu1 %v523_v1 }
   0x2   :  { %14 = vsyncpa [#allocation4], 0  ;;  %v575_v2 = vshrl.u32 %v32_v0, 7  ;;  %v31_v3 = vld [vmem:[%s676_s0] sm:$0xff]  ;;  %vm132_vm8 = vcmask 64512   ;;  %v131_v43 = vld [vmem:[%s679_s3 + $0x8] sm:$0xff] }
   0x3   :  { %v130_v42 = vld [vmem:[%s679_s3] sm:$0xff]  ;;  %v524_v45 = vmov 0   ;;  %v226_v46 = vld [vmem:[%s681_s5 + $0x10] sm:$0xff]  ;;  %v225_v47 = vld [vmem:[%s681_s5 + $0x8] sm:$0xff]  ;;  %vm248_vm9 = vcmask 130048   ;;  %s526_s13 = smov [#allocation3]  }
   0x4   :  { %v36_v4 = vsub.s32 0, %v575_v2  ;;  %v40_v5 = vsub.s32 4, %v575_v2  ;;  %v60_v6 = vsub.s32 1, %v575_v2  ;;  %v64_v7 = vsub.s32 5, %v575_v2  ;;  %v224_v44 = vld [vmem:[%s681_s5] sm:$0xff]  ;;  %497 = vset.pattern.permute.xlu0 %v524_v45  ;;  %498 = vset.pattern.permute.xlu1 %v524_v45  ;;  %v227_v48 = vld [vmem:[%s681_s5 + $0x18] sm:$0xff] }
   0x5   :  { %v84_v8 = vsub.s32 2, %v575_v2  ;;  %v88_v9 = vsub.s32 6, %v575_v2  ;;  %v108_v10 = vsub.s32 3, %v575_v2  ;;  %v112_v11 = vsub.s32 7, %v575_v2  ;;  %230 = vperm.xlu0 %497, %v224_v44   ;;  %240 = vperm.xlu1 %498, %v226_v46   ;;  %v358_v49 = vld [vmem:[%s682_s6] sm:$0xff]  ;;  %v359_v50 = vld [vmem:[%s682_s6 + $0x8] sm:$0xff] }
   0x6   :  { %v41_v12 = vrot.slane %v31_v3, %v40_v5  ;;  %v65_v13 = vrot.slane %v31_v3, %v64_v7  ;;  %v37_v14 = vrot.slane %v31_v3, %v36_v4  ;;  %v61_v15 = vrot.slane %v31_v3, %v60_v6  ;;  %v360_v51 = vld [vmem:[%s682_s6 + $0x10] sm:$0xff]  ;;  %v361_v52 = vld [vmem:[%s682_s6 + $0x18] sm:$0xff]  ;;  %v410_v53 = vld [vmem:[%s678_s2] sm:$0xff]  ;;  %s465_s14 = sshll.u32 %s526_s13, 4  ;;  %s466_s14 = int_to_ptr.vmem [resolvable:$true] %s465_s14 }
   0x7   :  { %v89_v16 = vrot.slane %v31_v3, %v88_v9  ;;  %v113_v17 = vrot.slane %v31_v3, %v112_v11  ;;  %v85_v18 = vrot.slane %v31_v3, %v84_v8  ;;  %v109_v19 = vrot.slane %v31_v3, %v108_v10  ;;  %v220_v3 = vld [vmem:[%s680_s4] sm:$0xff]  ;;  %v222_v5 = vld [vmem:[%s680_s4 + $0x10] sm:$0xff]  ;;  %s499_s15 = scalar_lea.vmem %s466_s14, 32  ;;  %p504_p1 = scmp.lt.s32.totalorder %s466_s14, %s466_s14 }
   0x8   :  { %v49_v20 = vrot.slane %v41_v12, %v36_v4  ;;  %v73_v21 = vrot.slane %v65_v13, %v60_v6  ;;  %v45_v22 = vrot.slane %v37_v14, %v36_v4  ;;  %v69_v23 = vrot.slane %v61_v15, %v60_v6  ;;  %v221_v4 = vld [vmem:[%s680_s4 + $0x8] sm:$0xff]  ;;  %v223_v6 = vld [vmem:[%s680_s4 + $0x18] sm:$0xff]  ;;  %v408_v14 = vld [vmem:[%s677_s1] sm:$0xff]  ;;  %p500_p0 = scmp.ne.s32.totalorder %s466_s14, %s499_s15  ;;  %p505_p2 = scmp.lt.s32.totalorder %s499_s15, %s499_s15 }
   0x9   :  { %v97_v24 = vrot.slane %v89_v16, %v84_v8  ;;  %v121_v25 = vrot.slane %v113_v17, %v108_v10  ;;  %v93_v26 = vrot.slane %v85_v18, %v84_v8  ;;  %v117_v27 = vrot.slane %v109_v19, %v108_v10  ;;  %235 = vperm.xlu0 %497, %v225_v47  }
   0xa   :  { %vm51_vm0 = vcmp.eq.s32.totalorder %v575_v2, %v49_v20  ;;  %vm75_vm1 = vcmp.eq.s32.totalorder %v575_v2, %v73_v21  ;;  %vm50_vm2 = vcmp.eq.s32.totalorder %v575_v2, %v45_v22  ;;  %vm74_vm3 = vcmp.eq.s32.totalorder %v575_v2, %v69_v23  ;;  %245 = vperm.xlu1 %498, %v227_v48   ;;  %p506_p3 = por %p505_p2, %p504_p1 }
   0xb   :  { %v474_v28 = vsel %vm51_vm0, 1.0, %v523_v1  ;;  %v476_v29 = vsel %vm75_vm1, 1.0, %v523_v1  ;;  %vm99_vm4 = vcmp.eq.s32.totalorder %v575_v2, %v97_v24  ;;  %vm123_vm5 = vcmp.eq.s32.totalorder %v575_v2, %v121_v25 }
   0xc   :  { %v81_v30 = vadd.f32 %v476_v29, %v474_v28  ;;  %v478_v31 = vsel %vm99_vm4, 1.0, %v523_v1  ;;  %v473_v32 = vsel %vm50_vm2, 1.0, %v523_v1  ;;  %v480_v33 = vsel %vm123_vm5, 1.0, %v523_v1  ;;  %p507_p4 = pnand %p506_p3, %p500_p0 }
   0xd   :  { %v475_v34 = vsel %vm74_vm3, 1.0, %v523_v1  ;;  %vm98_vm6 = vcmp.eq.s32.totalorder %v575_v2, %v93_v26  ;;  %vm122_vm7 = vcmp.eq.s32.totalorder %v575_v2, %v117_v27  ;;  %364 = vperm.xlu0 %497, %v358_v49   ;;  %vm456_vm10 = vcmp.lt.s32.totalorder %v32_v0, 256 }
   0xe   :  { %v105_v35 = vadd.f32 %v478_v31, %v81_v30  ;;  %v80_v36 = vadd.f32 %v475_v34, %v473_v32  ;;  %v477_v37 = vsel %vm98_vm6, 1.0, %v523_v1  ;;  %v479_v38 = vsel %vm122_vm7, 1.0, %v523_v1  ;;  %369 = vperm.xlu1 %498, %v359_v50  }
  0x10   :  { %v129_v39 = vadd.f32 %v480_v33, %v105_v35  ;;  %v104_v40 = vadd.f32 %v477_v37, %v80_v36 }
  0x11   :  { %374 = vperm.xlu0 %497, %v360_v51  }
  0x12   :  { %139 = vmatprep.subr.mxu0 %v129_v39  ;;  %v128_v41 = vadd.f32 %v479_v38, %v104_v40  ;;  %379 = vperm.xlu1 %498, %v361_v52  }
  0x14   :  { %140 = vmatpush1.msra.mxu0 %v128_v41 }
  0x15   :  { %481 = vmatmul.mubr.msk.f32.vlgmr.msra.gmra.mrb[0].mxu0 %vm132_vm8, %v130_v42  ;;  %413 = vperm.xlu0 %497, %v410_v53  }
  0x16   :  { %209 = vmatprep.mubr.f32.mxu0 %v523_v1 }
  0x19   :  { %482 = vmatmul.mubr.msk.f32.gmra.mrb[2].mxu0 %vm132_vm8, %v131_v43 }
  0x1a   :  { %325 = vmatprep.mubr.f32.mxu0 %v523_v1 }
  0x84   :  { %v231_v7 = vpop.permute.xlu0 %230  ;;  %v241_v10 = vpop.permute.xlu1 %240 }
  0x88   :  { %v236_v8 = vpop.permute.xlu0 %235 }
  0x89   :  { %v246_v12 = vpop.permute.xlu1 %245 }
  0x8c   :  { %v365_v9 = vpop.permute.xlu0 %364 }
  0x8d   :  { %v370_v27 = vpop.permute.xlu1 %369 }
  0x90   :  { %v375_v11 = vpop.permute.xlu0 %374 }
  0x94   :  { %v414_v13 = vpop.permute.xlu0 %413 }
  0x95   :  { %v416_v23 = vmul.f32 %v414_v13, %v408_v14  ;;  %v525_v14 = vmov 1966171168  }
  0x97   :  { %v418_v38 = vrot.slane %v416_v23, 4 }
  0x99   :  { %v419_v50 = vadd.f32 %v418_v38, %v416_v23 }
  0xe8   :  { %v205_v54 = vpop.f32.mrb[0].mxu0 }
  0xe9   :  { %v207_v55 = vpop.f32.mrb[1].mxu0  ;;  %v216_v57 = vmul.f32 0.25, %v205_v54  ;;  %v380_v54 = vpop.permute.xlu1 %379 }
  0xea   :  { %v217_v60 = vmul.f32 0.25, %v207_v55 }
  0xec   :  { %v211_v56 = vpop.f32.mrb[2].mxu0 }
  0xed   :  { %v218_v58 = vmul.f32 0.25, %v211_v56  ;;  %v213_v59 = vpop.f32.mrb[3].mxu0 }
  0xee   :  { %v219_v61 = vmul.f32 0.25, %v213_v59  ;;  %v420_v59 = vrot.slane %v419_v50, 2 }
  0xef   :  { %v489_v62 = vpack.c.bf16 %v218_v58, %v216_v57 }
  0xf0   :  { %v487_v63 = vpack.c.bf16 %v219_v61, %v217_v60 }
  0xf2   :  { %488 = vmatprep.subr.bf16.mxu0 %v487_v63  ;;  %491 = vmatprep.subr.bf16.mxu1 %v487_v63 }
  0xf3   :  { %490 = vmatpush1.bf16.msra.mxu0 %v489_v62  ;;  %492 = vmatpush1.bf16.msra.mxu1 %v489_v62 }
  0xf6   :  { %483 = vmatmul.mubr.msk.f32.vlgmr.msra.gmra.mrb[4].mxu0 %vm248_vm9, %v220_v3  ;;  %484 = vmatmul.mubr.msk.f32.vlgmr.msra.gmra.mrb[0].mxu1 %vm248_vm9, %v221_v4  ;;  %v421_v4 = vadd.f32 %v420_v59, %v419_v50 }
  0xf7   :  { %337 = vmatprep.mubr.f32.mxu1 %v523_v1 }
  0xfa   :  { %485 = vmatmul.mubr.msk.f32.gmra.mrb[2].mxu1 %vm248_vm9, %v222_v5 }
  0xfb   :  { %343 = vmatprep.mubr.f32.mxu1 %v523_v1  ;;  %v409_v1 = vld [vmem:[%s677_s1 + $0x8] sm:$0xff] }
  0xfc   :  { %v417_v26 = vmul.f32 %v414_v13, %v409_v1 }
  0xfe   :  { %486 = vmatmul.mubr.msk.f32.gmra.mrb[4].mxu1 %vm248_vm9, %v223_v6  ;;  %v424_v41 = vrot.slane %v417_v26, 4 }
 0x100   :  { %v425_v53 = vadd.f32 %v424_v41, %v417_v26 }
 0x102   :  { %v426_v61 = vrot.slane %v425_v53, 2 }
 0x104   :  { %v427_v6 = vadd.f32 %v426_v61, %v425_v53 }
 0x1c9   :  { %v327_v15 = vpop.f32.mrb[4].mxu0  ;;  %v333_v16 = vpop.f32.mrb[0].mxu1 }
 0x1ca   :  { %v328_v17 = vadd.f32 %v327_v15, %v231_v7  ;;  %v334_v18 = vadd.f32 %v333_v16, %v236_v8  ;;  %v329_v19 = vpop.f32.mrb[5].mxu0  ;;  %v335_v20 = vpop.f32.mrb[1].mxu1  ;;  %v440_v15 = vunpack.c.l.s4 %v525_v14 }
 0x1cb   :  { %v330_v21 = vadd.f32 %v329_v19, %v231_v7  ;;  %v336_v22 = vadd.f32 %v335_v20, %v236_v8 }
 0x1cc   :  { %v350_v24 = vmax.f32 %v328_v17, 0.0  ;;  %v352_v25 = vmax.f32 %v334_v18, 0.0 }
 0x1cd   :  { %v351_v28 = vmax.f32 %v330_v21, 0.0  ;;  %v353_v29 = vmax.f32 %v336_v22, 0.0  ;;  %v339_v30 = vpop.f32.mrb[2].mxu1  ;;  %v433_v21 = vstv %s683_s7  ;;  %v441_v22 = vunpack.c.0.s8 %v440_v15 }
 0x1ce   :  { %v382_v31 = vmul.f32 %v365_v9, %v350_v24  ;;  %v384_v32 = vmul.f32 %v370_v27, %v352_v25  ;;  %v340_v33 = vadd.f32 %v339_v30, %v241_v10  ;;  %v341_v34 = vpop.f32.mrb[3].mxu1 }
 0x1cf   :  { %v383_v35 = vmul.f32 %v365_v9, %v351_v28  ;;  %v385_v36 = vmul.f32 %v370_v27, %v353_v29  ;;  %v342_v37 = vadd.f32 %v341_v34, %v241_v10  ;;  %v422_v10 = vrot.slane %v421_v4, 1 }
 0x1d0   :  { %v390_v39 = vadd.f32 %v384_v32, %v382_v31  ;;  %v354_v40 = vmax.f32 %v340_v33, 0.0  ;;  %v444_v27 = vsub.s32 %v441_v22, %v575_v2 }
 0x1d1   :  { %v399_v42 = vadd.f32 %v385_v36, %v383_v35  ;;  %v355_v43 = vmax.f32 %v342_v37, 0.0  ;;  %v345_v44 = vpop.f32.mrb[4].mxu1  ;;  %v423_v17 = vadd.f32 %v422_v10, %v421_v4 }
 0x1d2   :  { %v386_v45 = vmul.f32 %v375_v11, %v354_v40  ;;  %v346_v46 = vadd.f32 %v345_v44, %v246_v12  ;;  %v347_v47 = vpop.f32.mrb[5].mxu1 }
 0x1d3   :  { %v387_v48 = vmul.f32 %v375_v11, %v355_v43  ;;  %v348_v49 = vadd.f32 %v347_v47, %v246_v12  ;;  %v428_v12 = vrot.slane %v427_v6, 1 }
 0x1d4   :  { %v391_v51 = vadd.f32 %v390_v39, %v386_v45  ;;  %v356_v52 = vmax.f32 %v346_v46, 0.0 }
 0x1d5   :  { %v400_v55 = vadd.f32 %v399_v42, %v387_v48  ;;  %v357_v56 = vmax.f32 %v348_v49, 0.0  ;;  %v429_v19 = vadd.f32 %v428_v12, %v427_v6 }
 0x1d6   :  { %v388_v57 = vmul.f32 %v380_v54, %v356_v52 }
 0x1d7   :  { %v389_v58 = vmul.f32 %v380_v54, %v357_v56 }
 0x1d8   :  { %v392_v60 = vadd.f32 %v391_v51, %v388_v57 }
 0x1d9   :  { %v401_v62 = vadd.f32 %v400_v55, %v389_v58 }
 0x1da   :  { %v393_v63 = vrot.slane %v392_v60, 4 }
 0x1db   :  { %v402_v3 = vrot.slane %v401_v62, 4 }
 0x1dc   :  { %v394_v5 = vadd.f32 %v393_v63, %v392_v60 }
 0x1dd   :  { %v403_v7 = vadd.f32 %v402_v3, %v401_v62 }
 0x1de   :  { %v395_v8 = vrot.slane %v394_v5, 2 }
 0x1df   :  { %v404_v9 = vrot.slane %v403_v7, 2 }
 0x1e0   :  { %v396_v11 = vadd.f32 %v395_v8, %v394_v5 }
 0x1e1   :  { %v405_v13 = vadd.f32 %v404_v9, %v403_v7 }
 0x1e2   :  { %v397_v16 = vrot.slane %v396_v11, 1 }
 0x1e3   :  { %v406_v1 = vrot.slane %v405_v13, 1 }
 0x1e4   :  { %v398_v18 = vadd.f32 %v397_v16, %v396_v11 }
 0x1e5   :  { %v407_v20 = vadd.f32 %v406_v1, %v405_v13 }
 0x1e6   :  { %v430_v23 = vadd.f32 %v423_v17, %v398_v18 }
 0x1e7   :  { %v431_v24 = vadd.f32 %v429_v19, %v407_v20 }
 0x1e8   :  { %v434_v25 = vadd.f32 %v433_v21, %v430_v23 }
 0x1e9   :  { %v435_v26 = vadd.f32 %v433_v21, %v431_v24 }
 0x1eb   :  { %v438_v28 = vcombine.low %v434_v25, %v435_v26 }
 0x1ed   :  { %v445_v29 = vrot.slane %v438_v28, %v444_v27 }
 0x1ef   :  { %v452_v30 = vrot.slane %v445_v29, %v444_v27 }
 0x1f1   :  { %458 = vst.msk [vmem:[#allocation3] sm:$0x3] %vm456_vm10, %v452_v30 }
 0x1f2   :  { %510 = shalt.err (!%p507_p4)
}
 0x1f3   :  { %s511_s16 = scalar_lea.hbm %s684_s8, 32 }
 0x1f4   :  { %p512_p5 = scmp.ne.s32.totalorder %s684_s8, %s511_s16  ;;  %p515_p6 = scmp.lt.u32.totalorder %s511_s16, %s684_s8 }
 0x1f6   :  { %p517_p7 = pnand %p515_p6, %p512_p5 }
 0x1f8   :  { %520 = shalt.err (!%p517_p7)
}
 0x1f9   :  { %468 = dma.vmem_to_hbm [thread:$0]  %s466_s14, 32, %s684_s8, [#allocation4]  }
 0x1fa   :  { %521 = dma.done.wait [#allocation4], 32  }
 0x1fb   :  { %522 = vsyncadd [#allocation4], 4294967264 }
 0x1fc   :  { %472 = vsyncpa [#allocation4], 1 }

</bundles_post_ra>
